<compile_context>
chip_gen: v7x
topology: tpu7x:2x2x1
jax: 0.10.0
libtpu: 0.0.40
codegen_flags: <defaults>
</compile_context>

<pallas_src>
import functools

import jax
import jax.numpy as jnp
from jax.experimental import pallas as pl
from jax.experimental.pallas import tpu as pltpu

_INV_SQRT2 = 0.7071067811865475  # 1/sqrt(2); weak-typed Python float, stays f32 in-kernel


def _round_up(x, m):
    return ((x + m - 1) // m) * m


def _vmem_capacity_bytes():
    """Per-core VMEM capacity; conservative fallback (v7x = 64 MiB) if the query fails."""
    try:
        return int(pltpu.get_tpu_info().vmem_capacity_bytes)
    except Exception:
        return 64 << 20


def _bert_head_transform_kernel(x_ref, w_ref, p_ref, o_ref, *, eps):
    # x_ref: (tm, H) native/matmul dtype     w_ref: (H, H) same dtype, resident (Buffered(1))
    # p_ref: (3, H) f32 = [bias; gamma; beta] (pre-cast in the wrapper)   o_ref: (tm, H)
    p = p_ref[...]
    bias, gamma, beta = p[0:1, :], p[1:2, :], p[2:3, :]

    # Dense: y = x @ W + b. Operands stay in their (possibly bf16) storage dtype so the MXU
    # runs at full rate; accumulation is forced to f32 so GELU/LayerNorm numerics are stable.
    y = jnp.dot(x_ref[...], w_ref[...], preferred_element_type=jnp.float32) + bias

    # Exact GELU (torch.nn.GELU default, erf-based).
    y = 0.5 * y * (1.0 + jax.lax.erf(y * _INV_SQRT2))

    # LayerNorm over the hidden (last) dim, biased variance, like torch.nn.LayerNorm.
    # One-pass statistics: var = E[y^2] - E[y]^2 (guard tiny negative from cancellation).
    mean = jnp.mean(y, axis=-1, keepdims=True)
    mean_sq = jnp.mean(y * y, axis=-1, keepdims=True)
    var = jnp.maximum(mean_sq - mean * mean, 0.0)
    inv = jax.lax.rsqrt(var + eps)

    o_ref[...] = ((y - mean) * inv * gamma + beta).astype(o_ref.dtype)


def prepare_params(weight, bias, gamma, beta, *, matmul_dtype=None):
    """One-time parameter prep.

    * Transposes the torch (out, in) weight so the kernel computes x @ W.
    * Optionally casts the weight to `matmul_dtype` (e.g. jnp.bfloat16) once, for full-rate
      MXU and half the weight VMEM/DMA when the model parameters arrive in f32.
    * Stacks bias / LN gamma / LN beta into a single (3, H) f32 slab (one operand, one DMA).
    """
    H = weight.shape[0]
    w_t = jnp.asarray(weight).T                      # (in, out): kernel does x @ W
    if matmul_dtype is not None:
        w_t = w_t.astype(matmul_dtype)
    params = jnp.stack([
        jnp.asarray(bias, jnp.float32).reshape(H),
        jnp.asarray(gamma, jnp.float32).reshape(H),
        jnp.asarray(beta, jnp.float32).reshape(H),
    ], axis=0)                                       # (3, H) f32
    return w_t, params


def bert_prediction_head_transform(x, w_t, params, *, eps=1e-12, tm_max=512, out_dtype=None):
    """x: (tokens, H). w_t: (H_in, H_out), already transposed (f32 or bf16).
    params: (3, H) f32 = [bias; gamma; beta]. Returns (tokens, H) in `out_dtype` (default x.dtype)."""
    M, H = x.shape
    out_dtype = x.dtype if out_dtype is None else out_dtype

    # Feed the MXU with matching operand dtypes; for bf16 weights this also halves x-tile DMA.
    if x.dtype != w_t.dtype:
        x = x.astype(w_t.dtype)

    # Row tile: balance the work across ceil(M / tm_max) steps so awkward M barely pads,
    # while each step still fills the MXU and stores a lane-dense output slab.
    n_steps = max(1, -(-M // tm_max))               # cdiv
    tm = _round_up(-(-M // n_steps), 8)             # round_up(cdiv(M, n_steps), 8)
    M_pad = tm * n_steps
    if M_pad != M:
        x = jnp.pad(x, ((0, M_pad - M), (0, 0)))    # zero rows; sliced off after the call

    itm = jnp.dtype(x.dtype).itemsize
    ito = jnp.dtype(out_dtype).itemsize
    itw = jnp.dtype(w_t.dtype).itemsize

    # VMEM footprint estimate: streamed tiles double-buffered, constant-index operands single.
    est = (2 * tm * H * itm            # x row tiles (double-buffered)
           + 2 * tm * H * ito          # output tiles (double-buffered)
           + H * H * itw               # resident weight, Buffered(1)
           + 8 * H * 4)                # (3,H) params padded to (8,H), Buffered(1)

    cap = _vmem_capacity_bytes()
    headroom = 6 << 20
    if est > cap - headroom:
        # TODO(synk): for H this large, add an N-tiled second grid axis for the dense step
        # plus a separate LayerNorm pass instead of keeping the whole weight resident.
        raise ValueError(
            f"Resident-weight working set (~{est >> 20} MiB) exceeds VMEM capacity "
            f"(~{cap >> 20} MiB); cast the weight to bf16 via prepare_params(matmul_dtype=...) "
            f"or add N-tiling.")
    vmem_limit = min(max(int(est * 1.5) + (4 << 20), 32 << 20), cap - headroom)

    kernel = functools.partial(_bert_head_transform_kernel, eps=eps)

    cost = pl.CostEstimate(
        flops=2 * M_pad * H * H + 12 * M_pad * H,
        transcendentals=M_pad * H,                  # erf (+ rsqrt per row)
        bytes_accessed=M_pad * H * itm + H * H * itw + 3 * H * 4 + M_pad * H * ito,
    )

    out = pl.pallas_call(
        kernel,
        out_shape=jax.ShapeDtypeStruct((M_pad, H), out_dtype),
        grid_spec=pltpu.PrefetchScalarGridSpec(
            num_scalar_prefetch=0,
            grid=(n_steps,),
            in_specs=[
                # Streamed row tile of x (default double-buffered pipelining).
                pl.BlockSpec((tm, H), lambda i: (i, 0)),
                # Full weight, constant index_map -> single buffer (halves its VMEM footprint).
                pl.BlockSpec((H, H), lambda i: (0, 0), pipeline_mode=pl.Buffered(1)),
                # Merged bias/gamma/beta slab, also single-buffered.
                pl.BlockSpec((3, H), lambda i: (0, 0), pipeline_mode=pl.Buffered(1)),
            ],
            out_specs=pl.BlockSpec((tm, H), lambda i: (i, 0)),
        ),
        compiler_params=pltpu.CompilerParams(
            # Row tiles are independent -> shard across TensorCores (2 TCs on v7x).
            dimension_semantics=("parallel",),
            vmem_limit_bytes=vmem_limit,
        ),
        cost_estimate=cost,
    )(x, w_t, params)

    return out[:M] if M_pad != M else out


def _reference(x, weight, bias, gamma, beta, eps=1e-12):
    y = x.astype(jnp.float32) @ weight.T.astype(jnp.float32) + bias.astype(jnp.float32)
    y = 0.5 * y * (1.0 + jax.lax.erf(y / jnp.sqrt(2.0)))
    mean = jnp.mean(y, axis=-1, keepdims=True)
    var = jnp.mean((y - mean) ** 2, axis=-1, keepdims=True)
    return ((y - mean) * jax.lax.rsqrt(var + eps)) * gamma + beta


if __name__ == "__main__":
    # Small shapes consistent with the module: batch=2, seq=8, hidden=128
    batch, seq, hidden = 2, 8, 128
    eps = 1e-12

    key = jax.random.PRNGKey(0)
    k_x, k_w, k_b, k_g, k_be = jax.random.split(key, 5)

    x = jax.random.normal(k_x, (batch, seq, hidden), dtype=jnp.float32)
    # Deterministic synthetic parameters (Linear: (out,in) + (out,); LayerNorm: (H,), (H,))
    weight = jax.random.normal(k_w, (hidden, hidden), dtype=jnp.float32) * 0.02
    bias = jax.random.normal(k_b, (hidden,), dtype=jnp.float32) * 0.02
    gamma = 1.0 + 0.01 * jax.random.normal(k_g, (hidden,), dtype=jnp.float32)
    beta = 0.01 * jax.random.normal(k_be, (hidden,), dtype=jnp.float32)

    x2d = x.reshape(batch * seq, hidden)  # glue reshape outside the kernel
    ref = _reference(x2d, weight, bias, gamma, beta, eps=eps)

    # 1) Exact f32 path: numerics match the torch module.
    w_t, params = prepare_params(weight, bias, gamma, beta)
    out = bert_prediction_head_transform(x2d, w_t, params, eps=eps)
    jax.block_until_ready(out)
    assert jnp.allclose(out, ref, atol=1e-4, rtol=1e-4), "f32 path mismatch vs reference"

    # 2) bf16-weight fast path (full-rate MXU, half weight/x DMA); f32 accumulate + f32 LN,
    #    so only the dense product loses precision -> looser tolerance vs the f32 reference.
    w_bf, params_bf = prepare_params(weight, bias, gamma, beta, matmul_dtype=jnp.bfloat16)
    out_bf = bert_prediction_head_transform(x2d, w_bf, params_bf, eps=eps,
                                            out_dtype=jnp.float32)
    jax.block_until_ready(out_bf)
    assert jnp.allclose(out_bf, ref, atol=5e-2, rtol=5e-2), "bf16 path mismatch vs reference"

    out3d = out.reshape(batch, seq, hidden)
    jax.block_until_ready(out3d)

    # TODO(synk): the torch module calls breakpoint() in forward — debugger hooks have no
    # Pallas equivalent and are omitted.
    print("KERNEL_OK")
</pallas_src>

<mosaic_0001>
module attributes {stable_mosaic.version = 11 : i64} {
  func.func @_bert_head_transform_kernel(%arg0: i32, %arg1: memref<16x128xf32, #tpu.memory_space<vmem>>, %arg2: memref<128x128xf32, #tpu.memory_space<vmem>>, %arg3: memref<3x128xf32, #tpu.memory_space<vmem>>, %arg4: memref<16x128xf32, #tpu.memory_space<vmem>>) attributes {dimension_semantics = [#tpu.dimension_semantics<parallel>], iteration_bounds = array<i64: 1>, scalar_prefetch = 0 : i64, scratch_operands = 0 : i64, tpu.core_type = #tpu.core_type<tc>, window_params = [{transform_indices = @transform_0, window_bounds = array<i64: 16, 128>}, {pipeline_mode = #tpu.pipeline_mode<synchronous>, transform_indices = @transform_1, window_bounds = array<i64: 128, 128>}, {pipeline_mode = #tpu.pipeline_mode<synchronous>, transform_indices = @transform_2, window_bounds = array<i64: 3, 128>}, {transform_indices = @transform_3, window_bounds = array<i64: 16, 128>}]} {
    %c0 = arith.constant 0 : index
    %c0_0 = arith.constant 0 : index
    %0 = vector.load %arg3[%c0, %c0_0] : memref<3x128xf32, #tpu.memory_space<vmem>>, vector<3x128xf32>
    %1 = vector.extract_strided_slice %0 {offsets = [0, 0], sizes = [1, 128], strides = [1, 1]} : vector<3x128xf32> to vector<1x128xf32>
    %2 = vector.extract_strided_slice %0 {offsets = [1, 0], sizes = [1, 128], strides = [1, 1]} : vector<3x128xf32> to vector<1x128xf32>
    %3 = vector.extract_strided_slice %0 {offsets = [2, 0], sizes = [1, 128], strides = [1, 1]} : vector<3x128xf32> to vector<1x128xf32>
    %c0_1 = arith.constant 0 : index
    %c0_2 = arith.constant 0 : index
    %4 = vector.load %arg1[%c0_1, %c0_2] : memref<16x128xf32, #tpu.memory_space<vmem>>, vector<16x128xf32>
    %c0_3 = arith.constant 0 : index
    %c0_4 = arith.constant 0 : index
    %5 = vector.load %arg2[%c0_3, %c0_4] : memref<128x128xf32, #tpu.memory_space<vmem>>, vector<128x128xf32>
    %cst = arith.constant dense<0.000000e+00> : vector<16x128xf32>
    %6 = tpu.matmul %4, %5, %cst {dimension_numbers = #tpu.dot_dimension_numbers<[1], [0], [0], [1], [0, 0, 1, 1], [], []>} : vector<16x128xf32>, vector<128x128xf32>, vector<16x128xf32> -> vector<16x128xf32>
    %7 = vector.broadcast %1 : vector<1x128xf32> to vector<16x128xf32>
    %8 = arith.addf %6, %7 : vector<16x128xf32>
    %cst_5 = arith.constant 5.000000e-01 : f32
    %9 = vector.broadcast %cst_5 : f32 to vector<16x128xf32>
    %10 = arith.mulf %9, %8 : vector<16x128xf32>
    %cst_6 = arith.constant 0.707106769 : f32
    %11 = vector.broadcast %cst_6 : f32 to vector<16x128xf32>
    %12 = arith.mulf %8, %11 : vector<16x128xf32>
    %13 = math.erf %12 : vector<16x128xf32>
    %cst_7 = arith.constant 1.000000e+00 : f32
    %14 = vector.broadcast %cst_7 : f32 to vector<16x128xf32>
    %15 = arith.addf %14, %13 : vector<16x128xf32>
    %16 = arith.mulf %10, %15 : vector<16x128xf32>
    %cst_8 = arith.constant dense<0.000000e+00> : vector<16xf32>
    %17 = vector.multi_reduction <add>, %16, %cst_8 [1] : vector<16x128xf32> to vector<16xf32>
    %18 = vector.shape_cast %17 : vector<16xf32> to vector<16x1xf32>
    %cst_9 = arith.constant 1.280000e+02 : f32
    %19 = vector.broadcast %cst_9 : f32 to vector<16x1xf32>
    %20 = arith.divf %18, %19 : vector<16x1xf32>
    %21 = arith.mulf %16, %16 : vector<16x128xf32>
    %cst_10 = arith.constant dense<0.000000e+00> : vector<16xf32>
    %22 = vector.multi_reduction <add>, %21, %cst_10 [1] : vector<16x128xf32> to vector<16xf32>
    %23 = vector.shape_cast %22 : vector<16xf32> to vector<16x1xf32>
    %cst_11 = arith.constant 1.280000e+02 : f32
    %24 = vector.broadcast %cst_11 : f32 to vector<16x1xf32>
    %25 = arith.divf %23, %24 : vector<16x1xf32>
    %26 = arith.mulf %20, %20 : vector<16x1xf32>
    %27 = arith.subf %25, %26 : vector<16x1xf32>
    %cst_12 = arith.constant 0.000000e+00 : f32
    %28 = vector.broadcast %cst_12 : f32 to vector<16x1xf32>
    %29 = arith.maximumf %27, %28 : vector<16x1xf32>
    %cst_13 = arith.constant 9.99999996E-13 : f32
    %30 = vector.broadcast %cst_13 : f32 to vector<16x1xf32>
    %31 = arith.addf %29, %30 : vector<16x1xf32>
    %32 = math.rsqrt %31 : vector<16x1xf32>
    %33 = vector.broadcast %20 : vector<16x1xf32> to vector<16x128xf32>
    %34 = arith.subf %16, %33 : vector<16x128xf32>
    %35 = vector.broadcast %32 : vector<16x1xf32> to vector<16x128xf32>
    %36 = arith.mulf %34, %35 : vector<16x128xf32>
    %37 = vector.broadcast %2 : vector<1x128xf32> to vector<16x128xf32>
    %38 = arith.mulf %36, %37 : vector<16x128xf32>
    %39 = vector.broadcast %3 : vector<1x128xf32> to vector<16x128xf32>
    %40 = arith.addf %38, %39 : vector<16x128xf32>
    %c0_14 = arith.constant 0 : index
    %c0_15 = arith.constant 0 : index
    %41 = vector.load %arg4[%c0_14, %c0_15] : memref<16x128xf32, #tpu.memory_space<vmem>>, vector<16x128xf32>
    tpu.vector_store %arg4[%c0_14, %c0_15], %40 {strides = array<i32>} : memref<16x128xf32, #tpu.memory_space<vmem>>, vector<16x128xf32>,
    return
  }
  func.func @transform_0(%arg0: i32) -> (i32, i32) {
    %c0_i32 = arith.constant 0 : i32
    %c0_i32_0 = arith.constant 0 : i32
    return %arg0, %c0_i32 : i32, i32
  }
  func.func @transform_1(%arg0: i32) -> (i32, i32) {
    %c0_i32 = arith.constant 0 : i32
    %c0_i32_0 = arith.constant 0 : i32
    %c0_i32_1 = arith.constant 0 : i32
    return %c0_i32, %c0_i32_0 : i32, i32
  }
  func.func @transform_2(%arg0: i32) -> (i32, i32) {
    %c0_i32 = arith.constant 0 : i32
    %c0_i32_0 = arith.constant 0 : i32
    %c0_i32_1 = arith.constant 0 : i32
    return %c0_i32, %c0_i32_0 : i32, i32
  }
  func.func @transform_3(%arg0: i32) -> (i32, i32) {
    %c0_i32 = arith.constant 0 : i32
    %c0_i32_0 = arith.constant 0 : i32
    return %arg0, %c0_i32 : i32, i32
  }
}

</mosaic_0001>

<bundles_post_ra>
// kernel: tpu_custom_call.1
= control target key start
LH: loop header
LB: loop body
LE: loop exit
PB: predicated region body
PF: predicated region fallthrough
CT: control target
= control target key end

     0   :  { %8 = vsyncpa [#allocation3], 0  ;;  %s455_s0 = inlined_call_operand.hbm [shape: f32[16,128], index: 0, kind: input, shape index: {}]   ;;  %s456_s1 = inlined_call_operand.hbm [shape: f32[128,128], index: 1, kind: input, shape index: {}]   ;;  %s457_s2 = inlined_call_operand.vmem [shape: f32[3,128], index: 2, kind: input, shape index: {}]   ;;  %s458_s3 = inlined_call_operand.hbm [shape: f32[16,128], index: 3, kind: output, shape index: {}]  }
   0x1   :  { %9 = vsyncpa [#allocation6], 0 }
   0x2   :  { %10 = vsyncpa [#allocation4], 0  ;;  %s382_s12 = smov [#allocation2]   ;;  %s310_s16 = scalar_lea.hbm %s455_s0, 256 }
   0x3   :  { %s16_s13 = sshll.u32 %s382_s12, 4  ;;  %p311_p0 = scmp.ne.s32.totalorder %s455_s0, %s310_s16  ;;  %s17_s13 = int_to_ptr.vmem [resolvable:$true] %s16_s13 }
   0x4   :  { %p314_p1 = scmp.lt.u32.totalorder %s310_s16, %s455_s0 }
   0x6   :  { %p316_p2 = pnand %p314_p1, %p311_p0 }
   0x8   :  { %319 = shalt.err (!%p316_p2)
}
   0x9   :  { %s320_s21 = scalar_lea.vmem %s17_s13, 256  ;;  %p325_p4 = scmp.lt.s32.totalorder %s17_s13, %s17_s13 }
   0xa   :  { %p321_p3 = scmp.ne.s32.totalorder %s17_s13, %s320_s21  ;;  %p326_p5 = scmp.lt.s32.totalorder %s320_s21, %s320_s21 }
   0xc   :  { %p327_p6 = por %p326_p5, %p325_p4 }
   0xe   :  { %p328_p7 = pnand %p327_p6, %p321_p3 }
  0x10   :  { %331 = shalt.err (!%p328_p7)
}
  0x11   :  { %s383_s22 = smov 128   ;;  %s384_s23 = smov 8  }
  0x12   :  { %22 = dma.hbm_to_vmem [thread:$0]  %s455_s0, 256, %s17_s13, [#allocation3], %s383_s22, %s383_s22, %s384_s23  }
  0x13   :  { %s385_s26 = smov [#allocation5]   ;;  %s332_s30 = scalar_lea.hbm %s456_s1, 2048 }
  0x14   :  { %s28_s27 = sshll.u32 %s385_s26, 4  ;;  %p333_p8 = scmp.ne.s32.totalorder %s456_s1, %s332_s30  ;;  %s29_s27 = int_to_ptr.vmem [resolvable:$true] %s28_s27 }
  0x15   :  { %p336_p9 = scmp.lt.u32.totalorder %s332_s30, %s456_s1 }
  0x17   :  { %p338_p10 = pnand %p336_p9, %p333_p8 }
  0x19   :  { %341 = shalt.err (!%p338_p10)
}
  0x1a   :  { %s342_s8 = scalar_lea.vmem %s29_s27, 2048  ;;  %p347_p12 = scmp.lt.s32.totalorder %s29_s27, %s29_s27 }
  0x1b   :  { %p343_p11 = scmp.ne.s32.totalorder %s29_s27, %s342_s8  ;;  %p348_p13 = scmp.lt.s32.totalorder %s342_s8, %s342_s8 }
  0x1d   :  { %p349_p0 = por %p348_p13, %p347_p12 }
  0x1f   :  { %p350_p1 = pnand %p349_p0, %p343_p11 }
  0x21   :  { %353 = shalt.err (!%p350_p1)
}
  0x22   :  { %34 = dma.hbm_to_vmem [thread:$0]  %s456_s1, 2048, %s29_s27, [#allocation6], %s383_s22, %s383_s22, %s384_s23  }
  0x23   :  { %376 = dma.done.wait [#allocation3], 256  }
  0x24   :  { %377 = vsyncadd [#allocation3], 4294967040 }
  0x25   :  { %378 = dma.done.wait [#allocation6], 2048  }
  0x26   :  { %379 = vsyncadd [#allocation6], 4294965248  ;;  %v46_v0 = vld [vmem:[#allocation5] sm:$0xff]  ;;  %v47_v1 = vld [vmem:[#allocation5 + $0x8] sm:$0xff]  ;;  %v62_v26 = vlaneseq }
  0x27   :  { %v48_v2 = vld [vmem:[#allocation5 + $0x10] sm:$0xff]  ;;  %v265_v3 = vpack.c.bf16 %v47_v1, %v46_v0  ;;  %v49_v4 = vld [vmem:[#allocation5 + $0x18] sm:$0xff]  ;;  %v50_v6 = vld [vmem:[#allocation5 + $0x20] sm:$0xff] }
  0x28   :  { %v269_v5 = vpack.c.bf16 %v49_v4, %v48_v2  ;;  %v51_v7 = vld [vmem:[#allocation5 + $0x28] sm:$0xff]  ;;  %v44_v9 = vld [vmem:[#allocation2] sm:$0xff]  ;;  %v53_v11 = vld [vmem:[#allocation5 + $0x38] sm:$0xff]  ;;  %v63_v27 = vshrl.u32 %v62_v26, 7 }
  0x29   :  { %266 = vmatprep.subr.bf16.mxu0 %v265_v3  ;;  %v273_v8 = vpack.c.bf16 %v51_v7, %v50_v6  ;;  %v52_v10 = vld [vmem:[#allocation5 + $0x30] sm:$0xff]  ;;  %262 = vmatprep.mubr.f32.mxu0 %v44_v9  ;;  %v54_v13 = vld [vmem:[#allocation5 + $0x40] sm:$0xff]  ;;  %v55_v14 = vld [vmem:[#allocation5 + $0x48] sm:$0xff] }
  0x2a   :  { %268 = vmatpush3.bf16.msra.mxu0 %v265_v3  ;;  %v277_v12 = vpack.c.bf16 %v53_v11, %v52_v10  ;;  %v281_v15 = vpack.c.bf16 %v55_v14, %v54_v13  ;;  %v56_v16 = vld [vmem:[#allocation5 + $0x50] sm:$0xff]  ;;  %v57_v17 = vld [vmem:[#allocation5 + $0x58] sm:$0xff]  ;;  %v58_v19 = vld [vmem:[#allocation5 + $0x60] sm:$0xff]  ;;  %v64_v28 = vsub.s32 0, %v63_v27  ;;  %v182_v63 = vsub.s32 1, %v63_v27 }
  0x2b   :  { %270 = vmatprep.subr.bf16.mxu0 %v269_v5  ;;  %v285_v18 = vpack.c.bf16 %v57_v17, %v56_v16  ;;  %v59_v20 = vld [vmem:[#allocation5 + $0x68] sm:$0xff]  ;;  %v60_v22 = vld [vmem:[#allocation5 + $0x70] sm:$0xff]  ;;  %v61_v23 = vld [vmem:[#allocation5 + $0x78] sm:$0xff]  ;;  %v188_v0 = vsub.s32 2, %v63_v27 }
  0x2c   :  { %v289_v21 = vpack.c.bf16 %v59_v20, %v58_v19  ;;  %v293_v24 = vpack.c.bf16 %v61_v23, %v60_v22  ;;  %v45_v25 = vld [vmem:[#allocation2 + $0x8] sm:$0xff]  ;;  %v43_v29 = vld [vmem:[%s457_s2] sm:$0x7]  ;;  %s386_s2 = smov [#allocation7]  }
  0x2d   :  { %v65_v30 = vrot.slane %v43_v29, %v64_v28  ;;  %v183_v1 = vrot.slane %v43_v29, %v182_v63  ;;  %v189_v4 = vrot.slane %v43_v29, %v188_v0  ;;  %s199_s11 = sshll.u32 %s386_s2, 4  ;;  %s200_s11 = int_to_ptr.vmem [resolvable:$true] %s199_s11 }
  0x2e   :  { %272 = vmatpush3.bf16.msra.mxu0 %v269_v5  ;;  %s354_s12 = scalar_lea.vmem %s200_s11, 256  ;;  %p359_p3 = scmp.lt.s32.totalorder %s200_s11, %s200_s11 }
  0x2f   :  { %274 = vmatprep.subr.bf16.mxu0 %v273_v8  ;;  %p355_p2 = scmp.ne.s32.totalorder %s200_s11, %s354_s12  ;;  %p360_p4 = scmp.lt.s32.totalorder %s354_s12, %s354_s12 }
  0x31   :  { %p361_p5 = por %p360_p4, %p359_p3 }
  0x32   :  { %276 = vmatpush3.bf16.msra.mxu0 %v273_v8 }
  0x33   :  { %278 = vmatprep.subr.bf16.mxu0 %v277_v12  ;;  %p362_p6 = pnand %p361_p5, %p355_p2 }
  0x36   :  { %280 = vmatpush3.bf16.msra.mxu0 %v277_v12 }
  0x37   :  { %282 = vmatprep.subr.bf16.mxu0 %v281_v15 }
  0x3a   :  { %284 = vmatpush3.bf16.msra.mxu0 %v281_v15 }
  0x3b   :  { %286 = vmatprep.subr.bf16.mxu0 %v285_v18 }
  0x3e   :  { %288 = vmatpush3.bf16.msra.mxu0 %v285_v18 }
  0x3f   :  { %290 = vmatprep.subr.bf16.mxu0 %v289_v21 }
  0x42   :  { %292 = vmatpush3.bf16.msra.mxu0 %v289_v21 }
  0x43   :  { %294 = vmatprep.subr.bf16.mxu0 %v293_v24 }
  0x46   :  { %296 = vmatpush3.bf16.msra.mxu0 %v293_v24 }
  0x49   :  { %263 = vmatmul.mubr.f32.vlgmr.msra.gmra.mrb[0].mxu0 %v45_v25 }
 0x11c   :  { %v264_v31 = vpop.f32.mrb[0].mxu0 }
 0x11d   :  { %v138_v32 = vadd.f32 %v264_v31, %v65_v30  ;;  %v132_v33 = vpop.f32.mrb[1].mxu0 }
 0x11e   :  { %v133_v34 = vadd.f32 %v132_v33, %v65_v30 }
 0x11f   :  { %v144_v35 = vmul.f32 0.70710677, %v138_v32  ;;  %v142_v42 = vmul.f32 0.5, %v138_v32 }
 0x120   :  { %v143_v36 = vmul.f32 0.70710677, %v133_v34  ;;  %v141_v40 = vmul.f32 0.5, %v133_v34 }
 0x121   :  { %302 = verf.f32 %v144_v35 }
 0x122   :  { %304 = verf.f32 %v143_v36 }
 0x12b   :  { %v303_v37 = vpop.eup %302 }
 0x12c   :  { %v305_v38 = vpop.eup %304  ;;  %v148_v39 = vadd.f32 1.0, %v303_v37 }
 0x12d   :  { %v147_v41 = vadd.f32 1.0, %v305_v38 }
 0x12e   :  { %v150_v45 = vmul.f32 %v148_v39, %v142_v42 }
 0x12f   :  { %v149_v43 = vmul.f32 %v147_v41, %v141_v40 }
 0x130   :  { %v159_v46 = vmul.f32 %v150_v45, %v150_v45 }
 0x131   :  { %151 = vadd.xlane.f32.xlu0 %v149_v43  ;;  %v158_v44 = vmul.f32 %v149_v43, %v149_v43 }
 0x133   :  { %160 = vadd.xlane.f32.xlu1 %v158_v44 }
 0x135   :  { %153 = vadd.xlane.f32.xlu0 %v150_v45 }
 0x137   :  { %162 = vadd.xlane.f32.xlu1 %v159_v46 }
 0x1be   :  { %v152_v47 = vpop.xlane.xlu0 %151 }
 0x1bf   :  { %v156_v48 = vmul.f32 0.0078125, %v152_v47 }
 0x1c0   :  { %v161_v49 = vpop.xlane.xlu1 %160 }
 0x1c1   :  { %v166_v50 = vmul.f32 %v156_v48, %v156_v48  ;;  %v164_v51 = vmul.f32 0.0078125, %v161_v49  ;;  %v176_v2 = vsub.f32 %v149_v43, %v156_v48 }
 0x1c2   :  { %v154_v52 = vpop.xlane.xlu0 %153 }
 0x1c3   :  { %v168_v53 = vsub.f32 %v164_v51, %v166_v50  ;;  %v157_v54 = vmul.f32 0.0078125, %v154_v52 }
 0x1c4   :  { %v163_v55 = vpop.xlane.xlu1 %162 }
 0x1c5   :  { %v170_v56 = vmax.f32 %v168_v53, 0.0  ;;  %v167_v57 = vmul.f32 %v157_v54, %v157_v54  ;;  %v165_v58 = vmul.f32 0.0078125, %v163_v55  ;;  %v177_v6 = vsub.f32 %v150_v45, %v157_v54 }
 0x1c7   :  { %v172_v59 = vadd.f32 1e-12, %v170_v56  ;;  %v169_v60 = vsub.f32 %v165_v58, %v167_v57 }
 0x1c9   :  { %306 = vrsqrt.f32 %v172_v59  ;;  %v171_v61 = vmax.f32 %v169_v60, 0.0 }
 0x1cb   :  { %v173_v62 = vadd.f32 1e-12, %v171_v61 }
 0x1cd   :  { %308 = vrsqrt.f32 %v173_v62 }
 0x1d3   :  { %v307_v3 = vpop.eup %306 }
 0x1d4   :  { %v178_v5 = vmul.f32 %v307_v3, %v176_v2 }
 0x1d6   :  { %v184_v7 = vmul.f32 %v183_v1, %v178_v5 }
 0x1d7   :  { %v309_v8 = vpop.eup %308 }
 0x1d8   :  { %v179_v9 = vmul.f32 %v309_v8, %v177_v6  ;;  %v190_v10 = vadd.f32 %v189_v4, %v184_v7 }
 0x1da   :  { %v185_v11 = vmul.f32 %v183_v1, %v179_v9  ;;  %192 = vst [vmem:[#allocation7] sm:$0xff] %v190_v10 }
 0x1dc   :  { %v191_v12 = vadd.f32 %v189_v4, %v185_v11 }
 0x1de   :  { %193 = vst [vmem:[#allocation7 + $0x8] sm:$0xff] %v191_v12 }
 0x1df   :  { %365 = shalt.err (!%p362_p6)
}
 0x1e0   :  { %s366_s15 = scalar_lea.hbm %s458_s3, 256 }
 0x1e1   :  { %p367_p7 = scmp.ne.s32.totalorder %s458_s3, %s366_s15  ;;  %p370_p8 = scmp.lt.u32.totalorder %s366_s15, %s458_s3 }
 0x1e3   :  { %p372_p9 = pnand %p370_p8, %p367_p7 }
 0x1e5   :  { %375 = shalt.err (!%p372_p9)
}
 0x1e6   :  { %205 = dma.vmem_to_hbm [thread:$0]  %s200_s11, 256, %s458_s3, [#allocation4], %s383_s22, %s383_s22, %s384_s23  }
 0x1e7   :  { %380 = dma.done.wait [#allocation4], 256  }
 0x1e8   :  { %381 = vsyncadd [#allocation4], 4294967040 }
 0x1e9   :  { %209 = vsyncpa [#allocation3], 1 }
 0x1ea   :  { %210 = vsyncpa [#allocation6], 1 }
 0x1eb   :  { %211 = vsyncpa [#allocation4], 1 }

</bundles_post_ra>
